<compile_context>
chip_gen: v7x
topology: tpu7x:2x2x1
jax: 0.10.0
libtpu: 0.0.40
codegen_flags: <defaults>
</compile_context>

<pallas_src>
import math
import jax
import jax.numpy as jnp
from jax.experimental import pallas as pl
from jax.experimental.pallas import tpu as pltpu


def _data_embedding_kernel(x_ref, mark3_ref, w3_ref, w2_ref, tab_ref, bb_ref, out_ref):
    # Per-grid-step (Bt batch elements) shapes:
    #   x_ref     (Bt, L, C)      compute dtype  value-conv input, pre-transposed (L=fea_num, C=input_len)
    #   mark3_ref (Bt, 3C, 4)     int32          temporal indices, already offset into the stacked table
    #   w3_ref    (3C, E_pad)     compute dtype  value-conv taps K-concatenated: w3[k*C+c, e] = W1[e, c, k]
    #   w2_ref    (L, 3C)         compute dtype  temporal taps  K-concatenated: w2[l, k*C+c] = W2[l, c, k]
    #   tab_ref   (3*76, E_pad)   compute dtype  3 pre-rolled copies of the fused sinusoid table
    #   bb_ref    (L, E_pad)      float32        combined bias  b1[e] + b2[l]
    #   out_ref   (Bt, L, E_pad)  float32
    Bt, L, C = x_ref.shape
    C3 = 3 * C
    E_pad = w3_ref.shape[1]
    G3 = tab_ref.shape[0]
    cdt = w3_ref.dtype

    # ---- value embedding: circular im2col + a single (Bt*L, 3C) @ (3C, E_pad) matmul ----
    x = x_ref[...]
    xp = jnp.concatenate([x[:, L - 1:L, :], x, x[:, 0:1, :]], axis=1)          # (Bt, L+2, C) circular pad
    x3 = jnp.concatenate([xp[:, 0:L, :], xp[:, 1:L + 1, :], xp[:, 2:L + 2, :]],
                         axis=2)                                               # (Bt, L, 3C)
    val = jnp.dot(x3.reshape(Bt * L, C3), w3_ref[...],
                  preferred_element_type=jnp.float32)                          # (Bt*L, E_pad) f32

    # ---- temporal embedding: fused 4-way one-hot lookup over the stacked pre-rolled table ----
    # Each row of the one-hot has 4 ones (month/day/weekday/hour), so the matmul directly
    # yields the *sum* of the four lookups, per conv tap.  Out-of-range indices map to zero
    # rows (inputs are generated in range; a real embedding would fault instead).
    col = mark3_ref[...].reshape(Bt * C3, 4)                                   # (Bt*3C, 4) i32
    lane = jax.lax.broadcasted_iota(jnp.int32, (Bt * C3, G3), 1)
    onehot = ((lane == col[:, 0:1]) | (lane == col[:, 1:2]) |
              (lane == col[:, 2:3]) | (lane == col[:, 3:4]))
    oh = onehot.astype(jnp.float32).astype(cdt)                                # (Bt*3C, 3*76)
    t3 = jnp.dot(oh, tab_ref[...], preferred_element_type=jnp.float32)         # (Bt*3C, E_pad) f32
    t3 = t3.reshape(Bt, C3, E_pad).astype(cdt)

    # ---- temporal conv: K-concatenated taps, one batched matmul over the Bt elements ----
    w2b = jnp.broadcast_to(w2_ref[...][None], (Bt, L, C3))
    tim = jnp.einsum('blc,bce->ble', w2b, t3,
                     preferred_element_type=jnp.float32)                       # (Bt, L, E_pad) f32

    # Position embedding adds zeros (no-op); dropout is identity at inference.
    out = val.reshape(Bt, L, E_pad) + tim + bb_ref[...][None]
    out_ref[...] = out.astype(out_ref.dtype)


def fixed_embedding_table(c_in, d_model):
    pos = jnp.arange(c_in, dtype=jnp.float32)[:, None]
    div = jnp.exp(jnp.arange(0, d_model, 2, dtype=jnp.float32)
                  * -(math.log(10000.0) / d_model))
    w = jnp.zeros((c_in, d_model), jnp.float32)
    w = w.at[:, 0::2].set(jnp.sin(pos * div))
    w = w.at[:, 1::2].set(jnp.cos(pos * div))
    return w


def make_params(key, input_len, fea_num, d_model):
    k1, k2, k3, k4 = jax.random.split(key, 4)
    fan_in = input_len * 3
    bound = 1.0 / math.sqrt(fan_in)
    w1 = jax.random.normal(k1, (d_model, input_len, 3), jnp.float32) * math.sqrt(2.0 / fan_in)
    b1 = jax.random.uniform(k2, (d_model,), jnp.float32, -bound, bound)
    w2 = jax.random.normal(k3, (fea_num, input_len, 3), jnp.float32) * math.sqrt(1.0 / fan_in)
    b2 = jax.random.uniform(k4, (fea_num,), jnp.float32, -bound, bound)
    return dict(w1=w1, b1=b1, w2=w2, b2=b2)


def data_embedding(x, x_mark, params, tables, *, block_b=None, matmul_dtype=jnp.float32):
    """x: (B, input_len, fea_num) f32; x_mark: (B, input_len, 4) int.  Returns (B, fea_num, d_model)."""
    B, C, L = x.shape                      # C = input_len, L = fea_num
    E = params["w1"].shape[0]              # d_model
    E_pad = ((E + 127) // 128) * 128       # lane-dense stores / matmul N
    C3 = 3 * C
    cdt = matmul_dtype

    # Batch tile: several elements per grid step amortize per-step pipeline overhead.
    # (For large B / d_model / input_len, re-derive Bt against the per-generation VMEM budget
    #  -- 64 MiB on v7x -- and keep the grid length >= a few steps per TensorCore.)
    Bt = block_b if block_b is not None else max(1, min(B, 16))
    nb = pl.cdiv(B, Bt)
    B_pad = nb * Bt

    # ---- trace-time constant packing (layout/index plumbing only) ----
    w1, b1 = params["w1"], params["b1"]                                    # (E, C, 3), (E,)
    w2, b2 = params["w2"], params["b2"]                                    # (L, C, 3), (L,)
    w3 = jnp.concatenate([w1[:, :, k].T for k in range(3)], axis=0)        # (3C, E)
    w3 = jnp.pad(w3, ((0, 0), (0, E_pad - E))).astype(cdt)
    w2cat = jnp.concatenate([w2[:, :, k] for k in range(3)], axis=1).astype(cdt)   # (L, 3C)
    bb = jnp.pad(b1[None, :] + b2[:, None],
                 ((0, 0), (0, E_pad - E))).astype(jnp.float32)             # (L, E_pad)

    # Fused temporal table: concat the 4 tables (76 rows), pre-roll along d_model for the
    # 3 circular-conv taps, zero-pad to E_pad, stack the 3 copies along rows -> (228, E_pad).
    tab = jnp.concatenate(list(tables), axis=0)                            # (76, E)
    G = tab.shape[0]
    tab_stack = jnp.concatenate(
        [jnp.pad(jnp.roll(tab, 1 - k, axis=1), ((0, 0), (0, E_pad - E))) for k in range(3)],
        axis=0).astype(cdt)                                                # (3G, E_pad)

    # Index plumbing: per-column group offsets + per-tap 76-row offsets folded into x_mark.
    offs, acc = [], 0
    for t in tables:
        offs.append(acc)
        acc += t.shape[0]
    off = jnp.asarray(offs, dtype=jnp.int32)                               # (4,)
    m = x_mark.astype(jnp.int32) + off[None, None, :]                      # (B, C, 4)
    mark3 = jnp.concatenate([m, m + G, m + 2 * G], axis=1)                 # (B, 3C, 4)

    # x to (B, fea_num, input_len) and compute dtype; pad batch to a multiple of Bt.
    x_t = jnp.transpose(x, (0, 2, 1)).astype(cdt)                          # (B, L, C)
    if B_pad != B:
        x_t = jnp.pad(x_t, ((0, B_pad - B), (0, 0), (0, 0)))
        mark3 = jnp.pad(mark3, ((0, B_pad - B), (0, 0), (0, 0)))

    def const_spec(a):
        return pl.BlockSpec(a.shape, lambda b, _nd=a.ndim: (0,) * _nd)

    out = pl.pallas_call(
        _data_embedding_kernel,
        out_shape=jax.ShapeDtypeStruct((B_pad, L, E_pad), jnp.float32),
        grid=(nb,),
        in_specs=[
            pl.BlockSpec((Bt, L, C), lambda b: (b, 0, 0)),       # x (transposed, batch tile)
            pl.BlockSpec((Bt, C3, 4), lambda b: (b, 0, 0)),      # offset temporal indices
            const_spec(w3), const_spec(w2cat),
            const_spec(tab_stack), const_spec(bb),
        ],
        out_specs=pl.BlockSpec((Bt, L, E_pad), lambda b: (b, 0, 0)),
        compiler_params=pltpu.CompilerParams(dimension_semantics=("parallel",)),
    )(x_t, mark3, w3, w2cat, tab_stack, bb)

    return out[:B, :, :E]


def _ref_forward(x, x_mark, params, tables):
    """Pure-JAX reference of the PyTorch forward (inference mode)."""
    month_t, day_t, wday_t, hour_t = tables

    def circ_conv1d(inp, w, b):                      # inp (B, Cin, Lc), w (Cout, Cin, 3)
        Lc = inp.shape[2]
        pad = jnp.concatenate([inp[:, :, -1:], inp, inp[:, :, :1]], axis=2)
        out = b[None, :, None]
        for k in range(3):
            out = out + jnp.einsum("oc,bcl->bol", w[:, :, k], pad[:, :, k:k + Lc])
        return out

    val = jnp.transpose(circ_conv1d(x, params["w1"], params["b1"]), (0, 2, 1))
    t = (month_t[x_mark[:, :, 0]] + day_t[x_mark[:, :, 1]] +
         wday_t[x_mark[:, :, 2]] + hour_t[x_mark[:, :, 3]])
    tim = circ_conv1d(t, params["w2"], params["b2"])
    return val + tim


if __name__ == "__main__":
    batch, seq_len, pre_len = 2, 8, 4
    fea_num, d_model = 16, 32
    flag = "enc"
    input_len = seq_len if flag == "enc" else pre_len   # 'enc' -> seq_len

    key = jax.random.PRNGKey(0)
    kx, km, kp = jax.random.split(key, 3)

    x = jax.random.normal(kx, (batch, input_len, fea_num), jnp.float32)
    # x_mark columns: [month(0..12), day(0..31), weekday(0..6), hour(0..23)]
    x_mark = jnp.stack(
        [jax.random.randint(jax.random.fold_in(km, i), (batch, input_len), 0, hi)
         for i, hi in enumerate([13, 32, 7, 24])],
        axis=-1).astype(jnp.int32)

    params = make_params(kp, input_len, fea_num, d_model)
    tables = (fixed_embedding_table(13, d_model),   # month
              fixed_embedding_table(32, d_model),   # day
              fixed_embedding_table(7, d_model),    # weekday
              fixed_embedding_table(24, d_model))   # hour

    ref = _ref_forward(x, x_mark, params, tables)

    # f32 path (default): exact-tolerance check against the pure-JAX reference.
    out = jax.block_until_ready(data_embedding(x, x_mark, params, tables))
    assert out.shape == (batch, fea_num, d_model)
    assert jnp.allclose(out, ref, atol=1e-4, rtol=1e-4), "f32 kernel mismatch vs reference"

    # bf16 MXU-operand fast path (v6e/v7x); f32 accumulation keeps the error small.
    out_bf16 = jax.block_until_ready(
        data_embedding(x, x_mark, params, tables, matmul_dtype=jnp.bfloat16))
    assert float(jnp.max(jnp.abs(out_bf16 - ref))) < 0.5, "bf16 kernel sanity check failed"

    print("KERNEL_OK")
</pallas_src>

<mosaic_0001>
module attributes {stable_mosaic.version = 11 : i64} {
  func.func @_data_embedding_kernel(%arg0: i32, %arg1: memref<2x16x8xf32, #tpu.memory_space<vmem>>, %arg2: memref<2x24x4xi32, #tpu.memory_space<vmem>>, %arg3: memref<24x128xf32, #tpu.memory_space<vmem>>, %arg4: memref<16x24xf32, #tpu.memory_space<vmem>>, %arg5: memref<228x128xf32, #tpu.memory_space<vmem>>, %arg6: memref<16x128xf32, #tpu.memory_space<vmem>>, %arg7: memref<2x16x128xf32, #tpu.memory_space<vmem>>) attributes {dimension_semantics = [#tpu.dimension_semantics<parallel>], iteration_bounds = array<i64: 1>, scalar_prefetch = 0 : i64, scratch_operands = 0 : i64, tpu.core_type = #tpu.core_type<tc>, window_params = [{transform_indices = @transform_0, window_bounds = array<i64: 2, 16, 8>}, {transform_indices = @transform_1, window_bounds = array<i64: 2, 24, 4>}, {pipeline_mode = #tpu.pipeline_mode<synchronous>, transform_indices = @transform_2, window_bounds = array<i64: 24, 128>}, {pipeline_mode = #tpu.pipeline_mode<synchronous>, transform_indices = @transform_3, window_bounds = array<i64: 16, 24>}, {pipeline_mode = #tpu.pipeline_mode<synchronous>, transform_indices = @transform_4, window_bounds = array<i64: 228, 128>}, {pipeline_mode = #tpu.pipeline_mode<synchronous>, transform_indices = @transform_5, window_bounds = array<i64: 16, 128>}, {transform_indices = @transform_6, window_bounds = array<i64: 2, 16, 128>}]} {
    %c0 = arith.constant 0 : index
    %c0_0 = arith.constant 0 : index
    %c0_1 = arith.constant 0 : index
    %0 = vector.load %arg1[%c0, %c0_0, %c0_1] : memref<2x16x8xf32, #tpu.memory_space<vmem>>, vector<2x16x8xf32>
    %1 = vector.extract_strided_slice %0 {offsets = [0, 15, 0], sizes = [2, 1, 8], strides = [1, 1, 1]} : vector<2x16x8xf32> to vector<2x1x8xf32>
    %2 = vector.extract_strided_slice %0 {offsets = [0, 0, 0], sizes = [2, 1, 8], strides = [1, 1, 1]} : vector<2x16x8xf32> to vector<2x1x8xf32>
    %3 = tpu.concatenate %1, %0, %2 in 1 : vector<2x1x8xf32>, vector<2x16x8xf32>, vector<2x1x8xf32> -> vector<2x18x8xf32>
    %4 = vector.extract_strided_slice %3 {offsets = [0, 0, 0], sizes = [2, 16, 8], strides = [1, 1, 1]} : vector<2x18x8xf32> to vector<2x16x8xf32>
    %5 = vector.extract_strided_slice %3 {offsets = [0, 1, 0], sizes = [2, 16, 8], strides = [1, 1, 1]} : vector<2x18x8xf32> to vector<2x16x8xf32>
    %6 = vector.extract_strided_slice %3 {offsets = [0, 2, 0], sizes = [2, 16, 8], strides = [1, 1, 1]} : vector<2x18x8xf32> to vector<2x16x8xf32>
    %7 = tpu.concatenate %4, %5, %6 in 2 : vector<2x16x8xf32>, vector<2x16x8xf32>, vector<2x16x8xf32> -> vector<2x16x24xf32>
    %8 = vector.shape_cast %7 : vector<2x16x24xf32> to vector<32x24xf32>
    %c0_2 = arith.constant 0 : index
    %c0_3 = arith.constant 0 : index
    %9 = vector.load %arg3[%c0_2, %c0_3] : memref<24x128xf32, #tpu.memory_space<vmem>>, vector<24x128xf32>
    %cst = arith.constant dense<0.000000e+00> : vector<32x128xf32>
    %10 = tpu.matmul %8, %9, %cst {dimension_numbers = #tpu.dot_dimension_numbers<[1], [0], [0], [1], [0, 0, 1, 1], [], []>} : vector<32x24xf32>, vector<24x128xf32>, vector<32x128xf32> -> vector<32x128xf32>
    %c0_4 = arith.constant 0 : index
    %c0_5 = arith.constant 0 : index
    %c0_6 = arith.constant 0 : index
    %11 = vector.load %arg2[%c0_4, %c0_5, %c0_6] : memref<2x24x4xi32, #tpu.memory_space<vmem>>, vector<2x24x4xi32>
    %12 = vector.shape_cast %11 : vector<2x24x4xi32> to vector<48x4xi32>
    %13 = tpu.iota {dimensions = array<i32: 1>} : vector<48x228xi32>
    %14 = vector.extract_strided_slice %12 {offsets = [0, 0], sizes = [48, 1], strides = [1, 1]} : vector<48x4xi32> to vector<48x1xi32>
    %15 = vector.broadcast %14 : vector<48x1xi32> to vector<48x228xi32>
    %16 = arith.cmpi eq, %13, %15 : vector<48x228xi32>
    %17 = vector.extract_strided_slice %12 {offsets = [0, 1], sizes = [48, 1], strides = [1, 1]} : vector<48x4xi32> to vector<48x1xi32>
    %18 = vector.broadcast %17 : vector<48x1xi32> to vector<48x228xi32>
    %19 = arith.cmpi eq, %13, %18 : vector<48x228xi32>
    %20 = arith.ori %16, %19 : vector<48x228xi1>
    %21 = vector.extract_strided_slice %12 {offsets = [0, 2], sizes = [48, 1], strides = [1, 1]} : vector<48x4xi32> to vector<48x1xi32>
    %22 = vector.broadcast %21 : vector<48x1xi32> to vector<48x228xi32>
    %23 = arith.cmpi eq, %13, %22 : vector<48x228xi32>
    %24 = arith.ori %20, %23 : vector<48x228xi1>
    %25 = vector.extract_strided_slice %12 {offsets = [0, 3], sizes = [48, 1], strides = [1, 1]} : vector<48x4xi32> to vector<48x1xi32>
    %26 = vector.broadcast %25 : vector<48x1xi32> to vector<48x228xi32>
    %27 = arith.cmpi eq, %13, %26 : vector<48x228xi32>
    %28 = arith.ori %24, %27 : vector<48x228xi1>
    %29 = arith.extui %28 : vector<48x228xi1> to vector<48x228xi32>
    %30 = arith.sitofp %29 : vector<48x228xi32> to vector<48x228xf32>
    %c0_7 = arith.constant 0 : index
    %c0_8 = arith.constant 0 : index
    %31 = vector.load %arg5[%c0_7, %c0_8] : memref<228x128xf32, #tpu.memory_space<vmem>>, vector<228x128xf32>
    %cst_9 = arith.constant dense<0.000000e+00> : vector<48x128xf32>
    %32 = tpu.matmul %30, %31, %cst_9 {dimension_numbers = #tpu.dot_dimension_numbers<[1], [0], [0], [1], [0, 0, 1, 1], [], []>} : vector<48x228xf32>, vector<228x128xf32>, vector<48x128xf32> -> vector<48x128xf32>
    %33 = vector.shape_cast %32 : vector<48x128xf32> to vector<2x24x128xf32>
    %c0_10 = arith.constant 0 : index
    %c0_11 = arith.constant 0 : index
    %34 = vector.load %arg4[%c0_10, %c0_11] : memref<16x24xf32, #tpu.memory_space<vmem>>, vector<16x24xf32>
    %35 = vector.shape_cast %34 : vector<16x24xf32> to vector<1x16x24xf32>
    %36 = vector.shape_cast %35 : vector<1x16x24xf32> to vector<1x16x24xf32>
    %37 = vector.broadcast %36 : vector<1x16x24xf32> to vector<2x16x24xf32>
    "tpu.trace_start"() <{level = 10 : i32, message = "blc,bce->ble"}> : () -> ()
    %cst_12 = arith.constant dense<0.000000e+00> : vector<2x16x128xf32>
    %38 = tpu.matmul %37, %33, %cst_12 {dimension_numbers = #tpu.dot_dimension_numbers<[2], [1], [1], [2], [0, 0, 0, 1, 1, 2], [0], [0]>} : vector<2x16x24xf32>, vector<2x24x128xf32>, vector<2x16x128xf32> -> vector<2x16x128xf32>
    "tpu.trace_stop"() : () -> ()
    %39 = vector.shape_cast %10 : vector<32x128xf32> to vector<2x16x128xf32>
    %40 = arith.addf %39, %38 : vector<2x16x128xf32>
    %c0_13 = arith.constant 0 : index
    %c0_14 = arith.constant 0 : index
    %41 = vector.load %arg6[%c0_13, %c0_14] : memref<16x128xf32, #tpu.memory_space<vmem>>, vector<16x128xf32>
    %42 = vector.shape_cast %41 : vector<16x128xf32> to vector<1x16x128xf32>
    %43 = vector.broadcast %42 : vector<1x16x128xf32> to vector<2x16x128xf32>
    %44 = arith.addf %40, %43 : vector<2x16x128xf32>
    %c0_15 = arith.constant 0 : index
    %c0_16 = arith.constant 0 : index
    %c0_17 = arith.constant 0 : index
    %45 = vector.load %arg7[%c0_15, %c0_16, %c0_17] : memref<2x16x128xf32, #tpu.memory_space<vmem>>, vector<2x16x128xf32>
    tpu.vector_store %arg7[%c0_15, %c0_16, %c0_17], %44 {strides = array<i32>} : memref<2x16x128xf32, #tpu.memory_space<vmem>>, vector<2x16x128xf32>,
    return
  }
  func.func @transform_0(%arg0: i32) -> (i32, i32, i32) {
    %c0_i32 = arith.constant 0 : i32
    %c0_i32_0 = arith.constant 0 : i32
    %c0_i32_1 = arith.constant 0 : i32
    return %arg0, %c0_i32, %c0_i32_0 : i32, i32, i32
  }
  func.func @transform_1(%arg0: i32) -> (i32, i32, i32) {
    %c0_i32 = arith.constant 0 : i32
    %c0_i32_0 = arith.constant 0 : i32
    %c0_i32_1 = arith.constant 0 : i32
    return %arg0, %c0_i32, %c0_i32_0 : i32, i32, i32
  }
  func.func @transform_2(%arg0: i32) -> (i32, i32) {
    %c0_i32 = arith.constant 0 : i32
    %c0_i32_0 = arith.constant 0 : i32
    %c0_i32_1 = arith.constant 0 : i32
    return %c0_i32, %c0_i32_0 : i32, i32
  }
  func.func @transform_3(%arg0: i32) -> (i32, i32) {
    %c0_i32 = arith.constant 0 : i32
    %c0_i32_0 = arith.constant 0 : i32
    %c0_i32_1 = arith.constant 0 : i32
    return %c0_i32, %c0_i32_0 : i32, i32
  }
  func.func @transform_4(%arg0: i32) -> (i32, i32) {
    %c0_i32 = arith.constant 0 : i32
    %c0_i32_0 = arith.constant 0 : i32
    %c0_i32_1 = arith.constant 0 : i32
    return %c0_i32, %c0_i32_0 : i32, i32
  }
  func.func @transform_5(%arg0: i32) -> (i32, i32) {
    %c0_i32 = arith.constant 0 : i32
    %c0_i32_0 = arith.constant 0 : i32
    %c0_i32_1 = arith.constant 0 : i32
    return %c0_i32, %c0_i32_0 : i32, i32
  }
  func.func @transform_6(%arg0: i32) -> (i32, i32, i32) {
    %c0_i32 = arith.constant 0 : i32
    %c0_i32_0 = arith.constant 0 : i32
    %c0_i32_1 = arith.constant 0 : i32
    return %arg0, %c0_i32, %c0_i32_0 : i32, i32, i32
  }
}

</mosaic_0001>

<bundles_post_ra>
// kernel: tpu_custom_call.1
= control target key start
LH: loop header
LB: loop body
LE: loop exit
PB: predicated region body
PF: predicated region fallthrough
CT: control target
= control target key end

     0   :  { %11 = vsyncpa [#allocation3], 0  ;;  %s1257_s0 = inlined_call_operand.vmem [shape: f32[2,16,8], index: 0, kind: input, shape index: {}]   ;;  %s1258_s1 = inlined_call_operand.vmem [shape: s32[2,24,4], index: 1, kind: input, shape index: {}]   ;;  %s1259_s2 = inlined_call_operand.vmem [shape: f32[24,128], index: 2, kind: input, shape index: {}]   ;;  %s1260_s3 = inlined_call_operand.vmem [shape: f32[16,24], index: 3, kind: input, shape index: {}]   ;;  %s1261_s4 = inlined_call_operand.hbm [shape: f32[228,128], index: 4, kind: input, shape index: {}]   ;;  %s1262_s5 = inlined_call_operand.vmem [shape: f32[16,128], index: 5, kind: input, shape index: {}]   ;;  %s1263_s6 = inlined_call_operand.hbm [shape: f32[2,16,128], index: 6, kind: output, shape index: {}]  }
   0x1   :  { %12 = vsyncpa [#allocation4], 0  ;;  %s962_s21 = smov [#allocation2]   ;;  %s914_s25 = scalar_lea.hbm %s1261_s4, 3712 }
   0x2   :  { %s26_s22 = sshll.u32 %s962_s21, 4  ;;  %p915_p0 = scmp.ne.s32.totalorder %s1261_s4, %s914_s25  ;;  %s27_s22 = int_to_ptr.vmem [resolvable:$true] %s26_s22 }
   0x3   :  { %p918_p1 = scmp.lt.u32.totalorder %s914_s25, %s1261_s4 }
   0x5   :  { %p920_p2 = pnand %p918_p1, %p915_p0 }
   0x7   :  { %923 = shalt.err (!%p920_p2)
}
   0x8   :  { %s924_s30 = scalar_lea.vmem %s27_s22, 3712  ;;  %p929_p4 = scmp.lt.s32.totalorder %s27_s22, %s27_s22 }
   0x9   :  { %p925_p3 = scmp.ne.s32.totalorder %s27_s22, %s924_s30  ;;  %p930_p5 = scmp.lt.s32.totalorder %s924_s30, %s924_s30 }
   0xb   :  { %p931_p6 = por %p930_p5, %p929_p4 }
   0xd   :  { %p932_p7 = pnand %p931_p6, %p925_p3 }
   0xf   :  { %935 = shalt.err (!%p932_p7)
}
  0x10   :  { %s963_s7 = smov 128   ;;  %s964_s8 = smov 8  }
  0x11   :  { %32 = dma.hbm_to_vmem [thread:$0]  %s1261_s4, 3712, %s27_s22, [#allocation3], %s963_s7, %s963_s7, %s964_s8  }
  0x12   :  { %958 = dma.done.wait [#allocation3], 3712  }
  0x13   :  { %959 = vsyncadd [#allocation3], 4294963584  ;;  %v965_v0 = vmov 2   ;;  %v966_v1 = vmov 0   ;;  %v967_v2 = vmov 0.0|0.0   ;;  %v216_v3 = vld [vmem:[%s1258_s1] sm:$0xff] }
  0x14   :  { %892 = vset.pattern.permute.xlu1 %v965_v0  ;;  %891 = vset.pattern.permute.xlu0 %v966_v1  ;;  %v405_v4 = vld [vmem:[#allocation2] sm:$0xff]  ;;  %v406_v5 = vld [vmem:[#allocation2 + $0x8] sm:$0xff]  ;;  %v968_v8 = vmov 3   ;;  %v407_v9 = vld [vmem:[#allocation2 + $0x10] sm:$0xff]  ;;  %v969_v18 = vmov 1   ;;  %v970_v53 = vmov 0.0  }
  0x15   :  { %825 = vmatprep.subr.bf16.mxu1 %v967_v2  ;;  %298 = vperm.xlu1 %892, %v216_v3   ;;  %v217_v6 = vld [vmem:[%s1258_s1 + $0x8] sm:$0xff]  ;;  %v826_v7 = vpack.c.bf16 %v406_v5, %v405_v4  ;;  %v408_v10 = vld [vmem:[#allocation2 + $0x18] sm:$0xff]  ;;  %v218_v11 = vld [vmem:[%s1258_s1 + $0x10] sm:$0xff]  ;;  %vm453_vm0 = vcmask 1043456   ;;  %vm50_vm1 = vcmask 1040384   ;;  %vm63_vm2 = vcmask 1046528  }
  0x16   :  { %226 = vperm.xlu0 %891, %v216_v3   ;;  %v829_v12 = vpack.c.bf16 %v408_v10, %v407_v9  ;;  %v409_v13 = vld [vmem:[#allocation2 + $0x20] sm:$0xff]  ;;  %v410_v14 = vld [vmem:[#allocation2 + $0x28] sm:$0xff]  ;;  %v411_v16 = vld [vmem:[#allocation2 + $0x30] sm:$0xff]  ;;  %vm84_vm3 = vcmask 1045504   ;;  %s973_s18 = smov [#allocation5]  }
  0x17   :  { %827 = vmatpush1.bf16.msra.mxu1 %v826_v7  ;;  %v832_v15 = vpack.c.bf16 %v410_v14, %v409_v13  ;;  %v412_v17 = vld [vmem:[#allocation2 + $0x38] sm:$0xff]  ;;  %v413_v20 = vld [vmem:[#allocation2 + $0x40] sm:$0xff]  ;;  %v414_v21 = vld [vmem:[#allocation2 + $0x48] sm:$0xff]  ;;  %s729_s19 = sshll.u32 %s973_s18, 4  ;;  %s730_s19 = int_to_ptr.vmem [resolvable:$true] %s729_s19 }
  0x18   :  { %828 = vmatprep.subr.bf16.mxu1 %v967_v2  ;;  %v835_v19 = vpack.c.bf16 %v412_v17, %v411_v16  ;;  %v219_v22 = vld [vmem:[%s1258_s1 + $0x18] sm:$0xff]  ;;  %v838_v23 = vpack.c.bf16 %v414_v21, %v413_v20  ;;  %v415_v24 = vld [vmem:[#allocation2 + $0x50] sm:$0xff]  ;;  %v220_v27 = vld [vmem:[%s1258_s1 + $0x20] sm:$0xff]  ;;  %s936_s20 = scalar_lea.vmem %s730_s19, 512  ;;  %p941_p9 = scmp.lt.s32.totalorder %s730_s19, %s730_s19 }
  0x19   :  { %893 = vset.pattern.permute.xlu1 %v968_v8  ;;  %v416_v25 = vld [vmem:[#allocation2 + $0x58] sm:$0xff]  ;;  %v417_v28 = vld [vmem:[#allocation2 + $0x60] sm:$0xff]  ;;  %v418_v29 = vld [vmem:[#allocation2 + $0x68] sm:$0xff]  ;;  %p937_p8 = scmp.ne.s32.totalorder %s730_s19, %s936_s20  ;;  %p942_p10 = scmp.lt.s32.totalorder %s936_s20, %s936_s20 }
  0x1a   :  { %896 = vset.pattern.permute.xlu0 %v968_v8  ;;  %340 = vperm.xlu1 %893, %v216_v3   ;;  %v841_v26 = vpack.c.bf16 %v416_v25, %v415_v24  ;;  %v844_v30 = vpack.c.bf16 %v418_v29, %v417_v28  ;;  %v419_v31 = vld [vmem:[#allocation2 + $0x70] sm:$0xff]  ;;  %v420_v32 = vld [vmem:[#allocation2 + $0x78] sm:$0xff]  ;;  %v421_v34 = vld [vmem:[#allocation2 + $0x80] sm:$0xff] }
  0x1b   :  { %343 = vperm.xlu0 %896, %v217_v6   ;;  %830 = vmatpush1.bf16.msra.mxu1 %v829_v12  ;;  %v847_v33 = vpack.c.bf16 %v420_v32, %v419_v31  ;;  %v422_v35 = vld [vmem:[#allocation2 + $0x88] sm:$0xff]  ;;  %v423_v38 = vld [vmem:[#allocation2 + $0x90] sm:$0xff]  ;;  %v424_v39 = vld [vmem:[#allocation2 + $0x98] sm:$0xff]  ;;  %v1264_v32 = vmov 0  ;;  %p943_p11 = por %p942_p10, %p941_p9 }
  0x1c   :  { %831 = vmatprep.subr.bf16.mxu1 %v967_v2  ;;  %v850_v36 = vpack.c.bf16 %v422_v35, %v421_v34  ;;  %v221_v37 = vld [vmem:[%s1258_s1 + $0x28] sm:$0xff]  ;;  %v853_v40 = vpack.c.bf16 %v424_v39, %v423_v38  ;;  %v425_v41 = vld [vmem:[#allocation2 + $0xa0] sm:$0xff]  ;;  %v427_v44 = vld [vmem:[#allocation2 + $0xb0] sm:$0xff]  ;;  %v972_v35 = vmov 1.0  }
  0x1d   :  { %v426_v42 = vld [vmem:[#allocation2 + $0xa8] sm:$0xff]  ;;  %v428_v45 = vld [vmem:[#allocation2 + $0xb8] sm:$0xff]  ;;  %v429_v47 = vld [vmem:[#allocation2 + $0xc0] sm:$0xff]  ;;  %p944_p12 = pnand %p943_p11, %p937_p8 }
  0x1e   :  { %894 = vset.pattern.permute.xlu1 %v966_v1  ;;  %v856_v43 = vpack.c.bf16 %v426_v42, %v425_v41  ;;  %v859_v46 = vpack.c.bf16 %v428_v45, %v427_v44  ;;  %v430_v48 = vld [vmem:[#allocation2 + $0xc8] sm:$0xff]  ;;  %v431_v50 = vld [vmem:[#allocation2 + $0xd0] sm:$0xff]  ;;  %v432_v51 = vld [vmem:[#allocation2 + $0xd8] sm:$0xff] }
  0x1f   :  { %899 = vset.pattern.permute.xlu0 %v965_v0  ;;  %229 = vperm.xlu1 %894, %v217_v6   ;;  %v862_v49 = vpack.c.bf16 %v430_v48, %v429_v47  ;;  %v865_v52 = vpack.c.bf16 %v432_v51, %v431_v50  ;;  %v433_v54 = vld [vmem:[#allocation2 + $0xe0] sm:$0xf]  ;;  %v39_v56 = vld [vmem:[%s1257_s0 + $0x8] sm:$0xff]  ;;  %v40_v59 = vld [vmem:[%s1257_s0 + $0x10] sm:$0xff] }
  0x20   :  { %304 = vperm.xlu0 %899, %v218_v11   ;;  %833 = vmatpush1.bf16.msra.mxu1 %v832_v15  ;;  %v38_v55 = vld [vmem:[%s1257_s0] sm:$0xff]  ;;  %v44_v57 = vrot.slane %v39_v56, 7  ;;  %v41_v60 = vld [vmem:[%s1257_s0 + $0x18] sm:$0xff]  ;;  %v53_v62 = vrot.slane %v40_v59, 7  ;;  %s971_s0 = smov 16   ;;  %v116_v56 = vld [vmem:[%s1259_s2 + $0x8] sm:$0xff] }
  0x21   :  { %834 = vmatprep.subr.bf16.mxu1 %v967_v2  ;;  %v51_v58 = vrot.slane %v38_v55, 7  ;;  %v45_v61 = vrot.slane %v41_v60, 7  ;;  %v115_v55 = vld [vmem:[%s1259_s2] sm:$0xff] }
  0x23   :  { %895 = vset.pattern.permute.xlu1 %v965_v0  ;;  %v1093_v63 = vsel %vm50_vm1, %v51_v58, %v44_v57  ;;  %v1103_v5 = vsel %vm50_vm1, %v53_v62, %v45_v61 }
  0x24   :  { %900 = vset.pattern.permute.xlu0 %v969_v18  ;;  %301 = vperm.xlu1 %895, %v217_v6   ;;  %v86_v4 = vrot.slane %v1093_v63, 2  ;;  %v69_v12 = vrot.slane %v1103_v5, 1  ;;  %v90_v16 = vrot.slane %v1103_v5, 2 }
  0x25   :  { %256 = vperm.xlu0 %900, %v216_v3   ;;  %836 = vmatpush1.bf16.msra.mxu1 %v835_v19 }
  0x26   :  { %837 = vmatprep.subr.bf16.mxu1 %v967_v2 }
  0x28   :  { %897 = vset.pattern.permute.xlu1 %v966_v1 }
  0x29   :  { %259 = vperm.xlu0 %900, %v217_v6   ;;  %232 = vperm.xlu1 %897, %v218_v11   ;;  %v1106_v6 = vsel %vm50_vm1, %v45_v61, %v53_v62  ;;  %v117_v61 = vld [vmem:[%s1259_s2 + $0x10] sm:$0xff] }
  0x2a   :  { %839 = vmatpush1.bf16.msra.mxu1 %v838_v23  ;;  %v89_v15 = vrot.slane %v1106_v6, 2  ;;  %v222_v23 = vlaneseq }
  0x2b   :  { %840 = vmatprep.subr.bf16.mxu1 %v967_v2 }
  0x2c   :  { %v91_v17 = vsel %vm84_vm3, %v89_v15, %v90_v16  ;;  %v1124_v24 = vand.u32 127, %v222_v23 }
  0x2d   :  { %265 = vperm.xlu0 %900, %v219_v22   ;;  %898 = vset.pattern.permute.xlu1 %v969_v18 }
  0x2e   :  { %262 = vperm.xlu1 %898, %v218_v11   ;;  %842 = vmatpush1.bf16.msra.mxu1 %v841_v26 }
  0x2f   :  { %843 = vmatprep.subr.bf16.mxu1 %v967_v2 }
  0x31   :  { %905 = vset.pattern.permute.xlu0 %v966_v1 }
  0x32   :  { %238 = vperm.xlu0 %905, %v220_v27   ;;  %901 = vset.pattern.permute.xlu1 %v968_v8 }
  0x33   :  { %346 = vperm.xlu1 %901, %v218_v11   ;;  %845 = vmatpush1.bf16.msra.mxu1 %v844_v30  ;;  %v68_v11 = vrot.slane %v1106_v6, 1 }
  0x34   :  { %846 = vmatprep.subr.bf16.mxu1 %v967_v2 }
  0x35   :  { %v70_v13 = vsel %vm63_vm2, %v68_v11, %v69_v12  ;;  %v71_v14 = vsel %vm63_vm2, %v69_v12, %v68_v11  ;;  %v552_v11 = vld [vmem:[%s1260_s3] sm:$0xff] }
  0x36   :  { %908 = vset.pattern.permute.xlu0 %v968_v8 }
  0x37   :  { %352 = vperm.xlu0 %908, %v220_v27   ;;  %902 = vset.pattern.permute.xlu1 %v966_v1 }
  0x38   :  { %235 = vperm.xlu1 %902, %v219_v22   ;;  %848 = vmatpush1.bf16.msra.mxu1 %v847_v33 }
  0x39   :  { %849 = vmatprep.subr.bf16.mxu1 %v967_v2 }
  0x3b   :  { %911 = vset.pattern.permute.xlu0 %v965_v0 }
  0x3c   :  { %313 = vperm.xlu0 %911, %v221_v37   ;;  %903 = vset.pattern.permute.xlu1 %v965_v0 }
  0x3d   :  { %307 = vperm.xlu1 %903, %v219_v22   ;;  %851 = vmatpush1.bf16.msra.mxu1 %v850_v36 }
  0x3e   :  { %852 = vmatprep.subr.bf16.mxu1 %v967_v2 }
  0x40   :  { %913 = vset.pattern.permute.xlu0 %v968_v8 }
  0x41   :  { %904 = vset.pattern.permute.xlu1 %v968_v8  ;;  %854 = vmatpush1.bf16.msra.mxu1 %v853_v40 }
  0x42   :  { %349 = vperm.xlu1 %904, %v219_v22   ;;  %855 = vmatprep.subr.bf16.mxu1 %v967_v2 }
  0x45   :  { %857 = vmatpush1.bf16.msra.mxu1 %v856_v43 }
  0x46   :  { %906 = vset.pattern.permute.xlu1 %v969_v18  ;;  %858 = vmatprep.subr.bf16.mxu1 %v967_v2 }
  0x47   :  { %268 = vperm.xlu1 %906, %v220_v27  }
  0x49   :  { %860 = vmatpush1.bf16.msra.mxu1 %v859_v46 }
  0x4a   :  { %861 = vmatprep.subr.bf16.mxu1 %v967_v2 }
  0x4b   :  { %907 = vset.pattern.permute.xlu1 %v965_v0  ;;  %v1096_v0 = vsel %vm50_vm1, %v44_v57, %v51_v58  ;;  %v821_v57 = vpack.c.bf16 %v116_v56, %v115_v55 }
  0x4c   :  { %310 = vperm.xlu1 %907, %v220_v27   ;;  %v85_v3 = vrot.slane %v1096_v0, 2  ;;  %v1127_v27 = vadd.s32 128, %v1124_v24 }
  0x4d   :  { %863 = vmatpush1.bf16.msra.mxu1 %v862_v49  ;;  %822 = vmatprep.subr.bf16.mxu0 %v821_v57 }
  0x4e   :  { %864 = vmatprep.subr.bf16.mxu1 %v967_v2  ;;  %v65_v2 = vrot.slane %v1093_v63, 1  ;;  %v87_v9 = vsel %vm84_vm3, %v85_v3, %v86_v4  ;;  %v88_v10 = vsel %vm84_vm3, %v86_v4, %v85_v3  ;;  %824 = vmatpush3.bf16.msra.mxu0 %v821_v57 }
  0x4f   :  { %795 = vmatprep.subr.mxu0 %v117_v61 }
  0x50   :  { %909 = vset.pattern.permute.xlu1 %v966_v1  ;;  %v64_v1 = vrot.slane %v1096_v0, 1 }
  0x51   :  { %241 = vperm.xlu1 %909, %v221_v37   ;;  %866 = vmatpush1.bf16.msra.mxu1 %v865_v52 }
  0x52   :  { %513 = vmatprep.subr.mxu1 %v970_v53  ;;  %v66_v7 = vsel %vm63_vm2, %v64_v1, %v65_v2  ;;  %796 = vmatpush3.msra.mxu0 %v117_v61 }
  0x55   :  { %910 = vset.pattern.permute.xlu1 %v969_v18  ;;  %757 = vmatpush1.msk.msra.mxu1 %vm453_vm0, %v433_v54  ;;  %v92_v18 = vsel %vm84_vm3, %v90_v16, %v89_v15 }
  0x56   :  { %271 = vperm.xlu1 %910, %v221_v37  }
  0x5a   :  { %912 = vset.pattern.permute.xlu1 %v968_v8  ;;  %v67_v8 = vsel %vm63_vm2, %v65_v2, %v64_v1 }
  0x5b   :  { %355 = vperm.xlu1 %912, %v221_v37   ;;  %74 = vrot.lane.b32.xlu0 %v67_v8, %s964_s8 }
  0x5f   :  { %72 = vrot.lane.b32.xlu1 %v66_v7, %s964_s8  ;;  %95 = vrot.lane.b32.xlu0 %v88_v10, %s971_s0 }
  0x63   :  { %93 = vrot.lane.b32.xlu1 %v87_v9, %s971_s0  ;;  %78 = vrot.lane.b32.xlu0 %v71_v14, %s964_s8 }
  0x67   :  { %76 = vrot.lane.b32.xlu1 %v70_v13, %s964_s8  ;;  %99 = vrot.lane.b32.xlu0 %v92_v18, %s971_s0  ;;  %v553_v18 = vld [vmem:[%s1260_s3 + $0x8] sm:$0xff] }
  0x6b   :  { %97 = vrot.lane.b32.xlu1 %v91_v17, %s971_s0 }
  0x94   :  { %v299_v19 = vpop.permute.xlu1 %298 }
  0x95   :  { %v227_v20 = vpop.permute.xlu0 %226  ;;  %vm315_vm10 = vcmp.eq.s32.totalorder %v1124_v24, %v299_v19  ;;  %vm316_vm12 = vcmp.eq.s32.totalorder %v1127_v27, %v299_v19 }
  0x96   :  { %vm243_vm4 = vcmp.eq.s32.totalorder %v1124_v24, %v227_v20  ;;  %vm244_vm5 = vcmp.eq.s32.totalorder %v1127_v27, %v227_v20 }
  0x99   :  { %v341_v21 = vpop.permute.xlu1 %340 }
  0x9a   :  { %v344_v22 = vpop.permute.xlu0 %343  ;;  %vm358_vm3 = vcmp.eq.s32.totalorder %v1127_v27, %v341_v21 }
  0x9e   :  { %v230_v25 = vpop.permute.xlu1 %229 }
  0x9f   :  { %v305_v26 = vpop.permute.xlu0 %304  ;;  %vm246_vm15 = vcmp.eq.s32.totalorder %v1127_v27, %v230_v25  ;;  %vm245_vm1 = vcmp.eq.s32.totalorder %v1124_v24, %v230_v25 }
  0xa3   :  { %v302_v28 = vpop.permute.xlu1 %301 }
  0xa4   :  { %v257_v29 = vpop.permute.xlu0 %256 }
  0xa5   :  { %vm273_vm6 = vcmp.eq.s32.totalorder %v1124_v24, %v257_v29  ;;  %vm274_vm7 = vcmp.eq.s32.totalorder %v1127_v27, %v257_v29 }
  0xa6   :  { %vm285_vm8 = vmor %vm243_vm4, %vm273_vm6  ;;  %vm318_vm6 = vcmp.eq.s32.totalorder %v1127_v27, %v302_v28 }
  0xa7   :  { %vm286_vm9 = vmor %vm244_vm5, %vm274_vm7  ;;  %vm434_vm5 = vcmask 818176  }
  0xa8   :  { %v260_v30 = vpop.permute.xlu0 %259  ;;  %v233_v31 = vpop.permute.xlu1 %232  ;;  %vm1136_vm13 = vmor %vm285_vm8, %vm315_vm10  ;;  %vm357_vm8 = vcmp.eq.s32.totalorder %v1124_v24, %v341_v21  ;;  %vm360_vm10 = vcmp.eq.s32.totalorder %v1127_v27, %v344_v22 }
  0xa9   :  { %vm276_vm11 = vcmp.eq.s32.totalorder %v1127_v27, %v260_v30  ;;  %v1265_v32 = vsel %vm1136_vm13, 4294967295, %v1264_v32  ;;  %vm275_vm14 = vcmp.eq.s32.totalorder %v1124_v24, %v260_v30  ;;  %vm328_vm0 = vmor %vm286_vm9, %vm316_vm12  ;;  %vm317_vm9 = vcmp.eq.s32.totalorder %v1124_v24, %v302_v28 }
  0xaa   :  { %vm288_vm2 = vmor %vm246_vm15, %vm276_vm11  ;;  %vm1266_vm11 = vnez %v1265_v32  ;;  %vm359_vm15 = vcmp.eq.s32.totalorder %v1124_v24, %v344_v22 }
  0xab   :  { %vm287_vm4 = vmor %vm245_vm1, %vm275_vm14  ;;  %vm248_vm1 = vcmp.eq.s32.totalorder %v1127_v27, %v233_v31 }
  0xac   :  { %vm370_vm7 = vmor %vm328_vm0, %vm358_vm3  ;;  %v266_v40 = vpop.permute.xlu0 %265 }
  0xad   :  { %v263_v33 = vpop.permute.xlu1 %262  ;;  %vm330_vm13 = vmor %vm288_vm2, %vm318_vm6  ;;  %v746_v34 = vsel %vm370_vm7, 1.0, %v970_v53  ;;  %vm320_vm6 = vcmp.eq.s32.totalorder %v1127_v27, %v305_v26 }
  0xae   :  { %758 = vmatprep.mubr.msk.f32.mxu1 %vm434_vm5, %v746_v34  ;;  %vm369_vm12 = vmor %vm1266_vm11, %vm357_vm8  ;;  %vm278_vm14 = vcmp.eq.s32.totalorder %v1127_v27, %v263_v33  ;;  %vm277_vm2 = vcmp.eq.s32.totalorder %v1124_v24, %v263_v33  ;;  %vm247_vm8 = vcmp.eq.s32.totalorder %v1124_v24, %v233_v31 }
  0xaf   :  { %vm329_vm0 = vmor %vm287_vm4, %vm317_vm9  ;;  %759 = vmatmul.mubr.msk.f32.vlgmr.msra.gmra.mrb[0].mxu1 %vm369_vm12, %v972_v35  ;;  %vm319_vm9 = vcmp.eq.s32.totalorder %v1124_v24, %v305_v26  ;;  %v715_v26 = vld [vmem:[%s1262_s5 + $0x8] sm:$0xff] }
  0xb0   :  { %vm372_vm3 = vmor %vm330_vm13, %vm360_vm10 }
  0xb1   :  { %vm290_vm7 = vmor %vm248_vm1, %vm278_vm14  ;;  %v748_v36 = vsel %vm372_vm3, 1.0, %v970_v53  ;;  %v239_v45 = vpop.permute.xlu0 %238 }
  0xb2   :  { %v347_v37 = vpop.permute.xlu1 %346  ;;  %760 = vmatprep.mubr.msk.f32.mxu1 %vm434_vm5, %v748_v36  ;;  %vm371_vm11 = vmor %vm329_vm0, %vm359_vm15  ;;  %vm279_vm0 = vcmp.eq.s32.totalorder %v1124_v24, %v266_v40 }
  0xb3   :  { %vm362_vm4 = vcmp.eq.s32.totalorder %v1127_v27, %v347_v37  ;;  %vm289_vm12 = vmor %vm247_vm8, %vm277_vm2  ;;  %761 = vmatmul.mubr.msk.f32.gmra.mrb[2].mxu1 %vm371_vm11, %v972_v35  ;;  %vm361_vm13 = vcmp.eq.s32.totalorder %v1124_v24, %v347_v37 }
  0xb4   :  { %vm332_vm10 = vmor %vm290_vm7, %vm320_vm6  ;;  %vm280_vm6 = vcmp.eq.s32.totalorder %v1127_v27, %v266_v40 }
  0xb5   :  { %vm374_vm1 = vmor %vm332_vm10, %vm362_vm4 }
  0xb6   :  { %vm331_vm14 = vmor %vm289_vm12, %vm319_vm9  ;;  %v750_v38 = vsel %vm374_vm1, 1.0, %v970_v53  ;;  %v353_v46 = vpop.permute.xlu0 %352 }
  0xb7   :  { %v236_v39 = vpop.permute.xlu1 %235  ;;  %vm373_vm3 = vmor %vm331_vm14, %vm361_vm13  ;;  %762 = vmatprep.mubr.msk.f32.mxu1 %vm434_vm5, %v750_v38 }
  0xb8   :  { %763 = vmatmul.mubr.msk.f32.gmra.mrb[4].mxu1 %vm373_vm3, %v972_v35  ;;  %vm249_vm15 = vcmp.eq.s32.totalorder %v1124_v24, %v236_v39  ;;  %vm250_vm2 = vcmp.eq.s32.totalorder %v1127_v27, %v236_v39 }
  0xb9   :  { %vm291_vm8 = vmor %vm249_vm15, %vm279_vm0  ;;  %vm251_vm15 = vcmp.eq.s32.totalorder %v1124_v24, %v239_v45 }
  0xba   :  { %vm292_vm11 = vmor %vm250_vm2, %vm280_vm6  ;;  %vm252_vm2 = vcmp.eq.s32.totalorder %v1127_v27, %v239_v45 }
  0xbb   :  { %v314_v51 = vpop.permute.xlu0 %313 }
  0xbc   :  { %v308_v41 = vpop.permute.xlu1 %307 }
  0xbd   :  { %vm322_vm7 = vcmp.eq.s32.totalorder %v1127_v27, %v308_v41  ;;  %vm321_vm4 = vcmp.eq.s32.totalorder %v1124_v24, %v308_v41 }
  0xbe   :  { %vm334_vm12 = vmor %vm292_vm11, %vm322_vm7 }
  0xbf   :  { %vm333_vm1 = vmor %vm291_vm8, %vm321_vm4  ;;  %vm366_vm4 = vcmp.eq.s32.totalorder %v1127_v27, %v353_v46 }
  0xc1   :  { %v350_v42 = vpop.permute.xlu1 %349 }
  0xc2   :  { %vm364_vm9 = vcmp.eq.s32.totalorder %v1127_v27, %v350_v42  ;;  %vm363_vm10 = vcmp.eq.s32.totalorder %v1124_v24, %v350_v42 }
  0xc3   :  { %vm376_vm13 = vmor %vm334_vm12, %vm364_vm9 }
  0xc4   :  { %v752_v43 = vsel %vm376_vm13, 1.0, %v970_v53  ;;  %vm375_vm14 = vmor %vm333_vm1, %vm363_vm10  ;;  %vm365_vm10 = vcmp.eq.s32.totalorder %v1124_v24, %v353_v46 }
  0xc5   :  { %764 = vmatprep.mubr.msk.f32.mxu1 %vm434_vm5, %v752_v43 }
  0xc6   :  { %v269_v44 = vpop.permute.xlu1 %268  ;;  %765 = vmatmul.mubr.msk.f32.gmra.mrb[6].mxu1 %vm375_vm14, %v972_v35 }
  0xc7   :  { %vm281_vm3 = vcmp.eq.s32.totalorder %v1124_v24, %v269_v44  ;;  %vm282_vm0 = vcmp.eq.s32.totalorder %v1127_v27, %v269_v44 }
  0xc8   :  { %vm293_vm6 = vmor %vm251_vm15, %vm281_vm3 }
  0xc9   :  { %vm294_vm11 = vmor %vm252_vm2, %vm282_vm0  ;;  %vm326_vm2 = vcmp.eq.s32.totalorder %v1127_v27, %v314_v51 }
  0xcb   :  { %v311_v47 = vpop.permute.xlu1 %310 }
  0xcc   :  { %vm323_vm7 = vcmp.eq.s32.totalorder %v1124_v24, %v311_v47  ;;  %vm324_vm8 = vcmp.eq.s32.totalorder %v1127_v27, %v311_v47 }
  0xcd   :  { %vm336_vm9 = vmor %vm294_vm11, %vm324_vm8  ;;  %vm325_vm8 = vcmp.eq.s32.totalorder %v1124_v24, %v314_v51  ;;  %v75_v59 = vpop.permute.xlu0 %74 }
  0xce   :  { %vm335_vm12 = vmor %vm293_vm6, %vm323_vm7 }
  0xcf   :  { %vm378_vm13 = vmor %vm336_vm9, %vm366_vm4 }
  0xd0   :  { %v242_v48 = vpop.permute.xlu1 %241  ;;  %v754_v49 = vsel %vm378_vm13, 1.0, %v970_v53  ;;  %vm377_vm1 = vmor %vm335_vm12, %vm365_vm10 }
  0xd1   :  { %766 = vmatprep.mubr.msk.f32.mxu1 %vm434_vm5, %v754_v49  ;;  %vm254_vm3 = vcmp.eq.s32.totalorder %v1127_v27, %v242_v48  ;;  %vm253_vm6 = vcmp.eq.s32.totalorder %v1124_v24, %v242_v48  ;;  %v96_v1 = vpop.permute.xlu0 %95 }
  0xd2   :  { %767 = vmatmul.mubr.msk.f32.gmra.mrb[8].mxu1 %vm377_vm1, %v972_v35  ;;  %vm105_vm1 = vcmask 64512  }
  0xd3   :  { %v107_v60 = vsel %vm105_vm1, %v1093_v63, %v75_v59 }
  0xd5   :  { %v272_v50 = vpop.permute.xlu1 %271  ;;  %v79_v63 = vpop.permute.xlu0 %78 }
  0xd6   :  { %vm284_vm14 = vcmp.eq.s32.totalorder %v1127_v27, %v272_v50  ;;  %vm283_vm15 = vcmp.eq.s32.totalorder %v1124_v24, %v272_v50  ;;  %v109_v7 = vsel %vm105_vm1, %v1103_v5, %v79_v63 }
  0xd7   :  { %vm296_vm0 = vmor %vm254_vm3, %vm284_vm14  ;;  %vm118_vm14 = vcmask 195584  }
  0xd8   :  { %vm295_vm7 = vmor %vm253_vm6, %vm283_vm15 }
  0xd9   :  { %vm338_vm4 = vmor %vm296_vm0, %vm326_vm2  ;;  %v100_v10 = vpop.permute.xlu0 %99 }
  0xda   :  { %v356_v52 = vpop.permute.xlu1 %355  ;;  %vm337_vm10 = vmor %vm295_vm7, %vm325_vm8 }
  0xdb   :  { %vm368_vm11 = vcmp.eq.s32.totalorder %v1127_v27, %v356_v52  ;;  %vm367_vm9 = vcmp.eq.s32.totalorder %v1124_v24, %v356_v52  ;;  %v714_v27 = vld [vmem:[%s1262_s5] sm:$0xff] }
  0xdc   :  { %vm380_vm12 = vmor %vm338_vm4, %vm368_vm11 }
  0xdd   :  { %v756_v54 = vsel %vm380_vm12, 1.0, %v970_v53  ;;  %vm379_vm13 = vmor %vm337_vm10, %vm367_vm9 }
  0xde   :  { %768 = vmatprep.mubr.msk.f32.mxu1 %vm434_vm5, %v756_v54  ;;  %v73_v58 = vpop.permute.xlu1 %72  ;;  %vm110_vm5 = vcmask 130048  }
  0xdf   :  { %769 = vmatmul.mubr.msk.f32.gmra.mrb[10].mxu1 %vm379_vm13, %v972_v35  ;;  %v106_v53 = vsel %vm105_vm1, %v1096_v0, %v73_v58  ;;  %v112_v2 = vsel %vm110_vm5, %v107_v60, %v96_v1  ;;  %v114_v12 = vsel %vm110_vm5, %v109_v7, %v100_v10 }
  0xe2   :  { %v94_v62 = vpop.permute.xlu1 %93 }
  0xe3   :  { %v111_v3 = vsel %vm110_vm5, %v106_v53, %v94_v62 }
  0xe4   :  { %797 = vmatprep.mubr.msk.f32.mxu0 %vm118_vm14, %v111_v3 }
  0xe5   :  { %798 = vmatmul.mubr.msk.f32.vlgmr.msra.gmra.mrb[0].mxu0 %vm118_vm14, %v112_v2 }
  0xe6   :  { %v77_v0 = vpop.permute.xlu1 %76 }
  0xe7   :  { %v108_v4 = vsel %vm105_vm1, %v1106_v6, %v77_v0 }
  0xea   :  { %v98_v8 = vpop.permute.xlu1 %97 }
  0xeb   :  { %v113_v9 = vsel %vm110_vm5, %v108_v4, %v98_v8 }
  0xec   :  { %800 = vmatprep.mubr.msk.f32.mxu0 %vm118_vm14, %v113_v9 }
  0xed   :  { %801 = vmatmul.mubr.msk.f32.gmra.mrb[2].mxu0 %vm118_vm14, %v114_v12 }
  0xee   :  { %809 = vmatprep.mubr.msk.f32.mxu0 %vm118_vm14, %v552_v11 }
 0x182   :  { %v523_v6 = vpop.f32.mrb[0].mxu1 }
 0x183   :  { %v525_v13 = vpop.f32.mrb[1].mxu1 }
 0x186   :  { %v528_v14 = vpop.f32.mrb[2].mxu1 }
 0x187   :  { %v867_v5 = vpack.c.bf16 %v528_v14, %v523_v6  ;;  %v530_v15 = vpop.f32.mrb[3].mxu1 }
 0x189   :  { %868 = vmatprep.subr.bf16.mxu0 %v867_v5 }
 0x18a   :  { %870 = vmatpush3.bf16.msra.mxu0 %v867_v5 }
 0x18b   :  { %v533_v16 = vpop.f32.mrb[4].mxu1 }
 0x18c   :  { %v535_v17 = vpop.f32.mrb[5].mxu1  ;;  %807 = vmatprep.subr.mxu0 %v533_v16 }
 0x18e   :  { %808 = vmatpush3.msra.mxu0 %v533_v16 }
 0x18f   :  { %810 = vmatmul.mubr.msk.f32.vlgmr.msra.gmra.mrb[0].mxu0 %vm118_vm14, %v553_v18 }
 0x190   :  { %818 = vmatprep.mubr.msk.f32.mxu0 %vm118_vm14, %v552_v11 }
 0x199   :  { %v538_v19 = vpop.f32.mrb[6].mxu1 }
 0x19a   :  { %v540_v20 = vpop.f32.mrb[7].mxu1 }
 0x1a5   :  { %v543_v21 = vpop.f32.mrb[8].mxu1 }
 0x1a6   :  { %v871_v22 = vpack.c.bf16 %v543_v21, %v538_v19  ;;  %v545_v23 = vpop.f32.mrb[9].mxu1 }
 0x1a8   :  { %872 = vmatprep.subr.bf16.mxu0 %v871_v22 }
 0x1a9   :  { %874 = vmatpush3.bf16.msra.mxu0 %v871_v22 }
 0x1b2   :  { %v548_v24 = vpop.f32.mrb[10].mxu1 }
 0x1b3   :  { %v550_v25 = vpop.f32.mrb[11].mxu1  ;;  %816 = vmatprep.subr.mxu0 %v548_v24 }
 0x1b4   :  { %817 = vmatpush3.msra.mxu0 %v548_v24 }
 0x1b5   :  { %819 = vmatmul.mubr.msk.f32.vlgmr.msra.gmra.mrb[2].mxu0 %vm118_vm14, %v553_v18 }
 0x262   :  { %v811_v28 = vpop.f32.mrb[0].mxu0 }
 0x263   :  { %v717_v29 = vadd.f32 %v811_v28, %v715_v26  ;;  %v626_v30 = vpop.f32.mrb[1].mxu0 }
 0x264   :  { %v716_v31 = vadd.f32 %v714_v27, %v626_v30 }
 0x265   :  { %721 = vst [vmem:[#allocation5 + $0x8] sm:$0xff] %v717_v29 }
 0x266   :  { %720 = vst [vmem:[#allocation5] sm:$0xff] %v716_v31 }
 0x288   :  { %v820_v32 = vpop.f32.mrb[2].mxu0 }
 0x289   :  { %v719_v33 = vadd.f32 %v820_v32, %v715_v26  ;;  %v701_v34 = vpop.f32.mrb[3].mxu0 }
 0x28a   :  { %v718_v35 = vadd.f32 %v714_v27, %v701_v34 }
 0x28b   :  { %723 = vst [vmem:[#allocation5 + $0x18] sm:$0xff] %v719_v33 }
 0x28c   :  { %722 = vst [vmem:[#allocation5 + $0x10] sm:$0xff] %v718_v35 }
 0x28d   :  { %947 = shalt.err (!%p944_p12)
}
 0x28e   :  { %s948_s1 = scalar_lea.hbm %s1263_s6, 512 }
 0x28f   :  { %p949_p13 = scmp.ne.s32.totalorder %s1263_s6, %s948_s1  ;;  %p952_p0 = scmp.lt.u32.totalorder %s948_s1, %s1263_s6 }
 0x291   :  { %p954_p1 = pnand %p952_p0, %p949_p13 }
 0x293   :  { %957 = shalt.err (!%p954_p1)
}
 0x294   :  { %735 = dma.vmem_to_hbm [thread:$0]  %s730_s19, 512, %s1263_s6, [#allocation4], %s963_s7, %s963_s7, %s964_s8  }
 0x295   :  { %960 = dma.done.wait [#allocation4], 512  }
 0x296   :  { %961 = vsyncadd [#allocation4], 4294966784 }
 0x297   :  { %739 = vsyncpa [#allocation3], 1 }
 0x298   :  { %740 = vsyncpa [#allocation4], 1 }

</bundles_post_ra>
